<compile_context>
chip_gen: v5e
topology: v5e:2x2
jax: 0.10.0
libtpu: 0.0.40
codegen_flags: <defaults>
</compile_context>

<pallas_src>
import functools

import jax
import jax.numpy as jnp
from jax import lax
from jax.experimental import pallas as pl
from jax.experimental.pallas import tpu as pltpu


_VMEM_LIMIT_BYTES = 48 << 20        # safe on v5e/v6e (128 MiB phys) and v7x (64 MiB phys)
_TILE_TARGET_F32_BYTES = 4 << 20    # target f32 working-set bytes per row tile


def _ls_ce_kernel(x_ref, tgt_ref, loss_ref, *, smoothing):
    """Per-row label-smoothed NLL over one (row_tile, C) tile."""
    confidence = 1.0 - smoothing
    x = x_ref[...].astype(jnp.float32)            # (TN, C), math in f32
    tgt = tgt_ref[...]                            # (TN, 1) int32
    inv_c = 1.0 / x.shape[-1]

    # Folded loss: with logprobs = x - m - lse,
    #   nll    = m + lse - x[tgt]
    #   smooth = m + lse - mean(x)
    #   loss   = (m + lse) - confidence*x[tgt] - smoothing*mean(x)
    m = jnp.max(x, axis=-1, keepdims=True)                                   # (TN, 1)
    lse = jnp.log(jnp.sum(jnp.exp(x - m), axis=-1, keepdims=True))           # (TN, 1)
    col = lax.broadcasted_iota(jnp.int32, x.shape, 1)
    x_tgt = jnp.sum(jnp.where(col == tgt, x, 0.0), axis=-1, keepdims=True)   # (TN, 1)
    mean_x = jnp.sum(x, axis=-1, keepdims=True) * inv_c                      # (TN, 1)

    loss_ref[...] = (m + lse) - confidence * x_tgt - smoothing * mean_x


def _pick_row_tile(n, c, itemsize):
    """Largest row tile that keeps the f32 working set ~_TILE_TARGET_F32_BYTES
    and divides N (or is the full N, which is always a legal block)."""
    sub = 8 if itemsize >= 4 else max(32 // itemsize, 8)   # sublane packing
    max_rows = max(_TILE_TARGET_F32_BYTES // (4 * c), sub)
    max_rows = max((max_rows // sub) * sub, sub)
    if n <= max_rows:
        return n                       # single full-extent block
    if n % sub != 0:
        # TODO(synk): pad N up to a multiple of the sublane pack and mask padded rows.
        return n
    t = (max_rows // sub) * sub
    while t > sub and n % t != 0:
        t -= sub
    return t if n % t == 0 else sub


def label_smoothing_cross_entropy(x, target, smoothing=0.1):
    """x: (N, C) float logits (f32 or bf16); target: (N,) int labels. Returns scalar."""
    assert smoothing < 1.0
    N, C = x.shape
    itemsize = jnp.dtype(x.dtype).itemsize
    row_tile = _pick_row_tile(N, C, itemsize)
    assert N % row_tile == 0
    grid = (N // row_tile,)
    tgt2d = target.astype(jnp.int32).reshape(N, 1)

    kernel = functools.partial(_ls_ce_kernel, smoothing=float(smoothing))

    cost = pl.CostEstimate(
        flops=5 * N * C,
        transcendentals=N * C + N,                       # exp over logits + per-row log
        bytes_accessed=N * C * itemsize + N * 4 + N * 4,  # logits + targets + per-row loss
    )

    per_row_loss = pl.pallas_call(
        kernel,
        out_shape=jax.ShapeDtypeStruct((N, 1), jnp.float32),
        grid=grid,
        in_specs=[
            pl.BlockSpec((row_tile, C), lambda i: (i, 0)),
            pl.BlockSpec((row_tile, 1), lambda i: (i, 0)),
        ],
        out_specs=pl.BlockSpec((row_tile, 1), lambda i: (i, 0)),
        compiler_params=pltpu.CompilerParams(
            dimension_semantics=("parallel",),
            vmem_limit_bytes=_VMEM_LIMIT_BYTES,
        ),
        cost_estimate=cost,
    )(x, tgt2d)

    # Tiny final batch reduction in the wrapper: keeps the grid axis parallel
    # and avoids serial-accumulator drift for very large N.
    return jnp.sum(per_row_loss) / jnp.float32(N)


def _reference(x, target, smoothing=0.1):
    confidence = 1.0 - smoothing
    logprobs = jax.nn.log_softmax(x.astype(jnp.float32), axis=-1)
    nll = -jnp.take_along_axis(logprobs, target[:, None], axis=-1)[:, 0]
    smooth = -jnp.mean(logprobs, axis=-1)
    return jnp.mean(confidence * nll + smoothing * smooth)


if __name__ == "__main__":
    # Small demo consistent with the PyTorch (batch, num_classes) contract.
    key = jax.random.PRNGKey(0)
    kx, kt = jax.random.split(key)
    N, C = 16, 32
    x = jax.random.normal(kx, (N, C), dtype=jnp.float32)
    target = jax.random.randint(kt, (N,), 0, C, dtype=jnp.int32)

    loss = jax.block_until_ready(label_smoothing_cross_entropy(x, target, smoothing=0.1))
    ref = _reference(x, target, smoothing=0.1)
    assert jnp.allclose(loss, ref, rtol=2e-5, atol=2e-5), (loss, ref)

    # Second config that exercises the multi-tile (grid > 1) path.
    kx2, kt2 = jax.random.split(jax.random.PRNGKey(1))
    N2, C2 = 2048, 1024
    x2 = jax.random.normal(kx2, (N2, C2), dtype=jnp.float32)
    t2 = jax.random.randint(kt2, (N2,), 0, C2, dtype=jnp.int32)
    loss2 = jax.block_until_ready(label_smoothing_cross_entropy(x2, t2, smoothing=0.1))
    ref2 = _reference(x2, t2, smoothing=0.1)
    assert jnp.allclose(loss2, ref2, rtol=1e-4, atol=1e-4), (loss2, ref2)

    print("KERNEL_OK")
</pallas_src>

<mosaic_0001>
module attributes {stable_mosaic.version = 11 : i64} {
  func.func @_ls_ce_kernel(%arg0: i32, %arg1: memref<16x32xf32, #tpu.memory_space<vmem>>, %arg2: memref<16x1xi32, #tpu.memory_space<vmem>>, %arg3: memref<16x1xf32, #tpu.memory_space<vmem>>) attributes {dimension_semantics = [#tpu.dimension_semantics<parallel>], iteration_bounds = array<i64: 1>, scalar_prefetch = 0 : i64, scratch_operands = 0 : i64, tpu.core_type = #tpu.core_type<tc>, window_params = [{transform_indices = @transform_0, window_bounds = array<i64: 16, 32>}, {transform_indices = @transform_1, window_bounds = array<i64: 16, 1>}, {transform_indices = @transform_2, window_bounds = array<i64: 16, 1>}]} {
    %c0 = arith.constant 0 : index
    %c0_0 = arith.constant 0 : index
    %0 = vector.load %arg1[%c0, %c0_0] : memref<16x32xf32, #tpu.memory_space<vmem>>, vector<16x32xf32>
    %c0_1 = arith.constant 0 : index
    %c0_2 = arith.constant 0 : index
    %1 = vector.load %arg2[%c0_1, %c0_2] : memref<16x1xi32, #tpu.memory_space<vmem>>, vector<16x1xi32>
    %cst = arith.constant dense<0xFF800000> : vector<16xf32>
    %2 = vector.multi_reduction <maximumf>, %0, %cst [1] : vector<16x32xf32> to vector<16xf32>
    %3 = vector.shape_cast %2 : vector<16xf32> to vector<16x1xf32>
    %4 = vector.broadcast %3 : vector<16x1xf32> to vector<16x32xf32>
    %5 = arith.subf %0, %4 : vector<16x32xf32>
    %6 = math.exp %5 : vector<16x32xf32>
    %cst_3 = arith.constant dense<0.000000e+00> : vector<16xf32>
    %7 = vector.multi_reduction <add>, %6, %cst_3 [1] : vector<16x32xf32> to vector<16xf32>
    %8 = vector.shape_cast %7 : vector<16xf32> to vector<16x1xf32>
    %9 = math.log %8 : vector<16x1xf32>
    %10 = tpu.iota {dimensions = array<i32: 1>} : vector<16x32xi32>
    %11 = vector.broadcast %1 : vector<16x1xi32> to vector<16x32xi32>
    %12 = arith.cmpi eq, %10, %11 : vector<16x32xi32>
    %cst_4 = arith.constant 0.000000e+00 : f32
    %13 = vector.broadcast %cst_4 : f32 to vector<16x32xf32>
    %14 = arith.select %12, %0, %13 : vector<16x32xi1>, vector<16x32xf32>
    %cst_5 = arith.constant dense<0.000000e+00> : vector<16xf32>
    %15 = vector.multi_reduction <add>, %14, %cst_5 [1] : vector<16x32xf32> to vector<16xf32>
    %16 = vector.shape_cast %15 : vector<16xf32> to vector<16x1xf32>
    %cst_6 = arith.constant dense<0.000000e+00> : vector<16xf32>
    %17 = vector.multi_reduction <add>, %0, %cst_6 [1] : vector<16x32xf32> to vector<16xf32>
    %18 = vector.shape_cast %17 : vector<16xf32> to vector<16x1xf32>
    %cst_7 = arith.constant 3.125000e-02 : f32
    %19 = vector.broadcast %cst_7 : f32 to vector<16x1xf32>
    %20 = arith.mulf %18, %19 : vector<16x1xf32>
    %21 = arith.addf %3, %9 : vector<16x1xf32>
    %cst_8 = arith.constant 0.899999976 : f32
    %22 = vector.broadcast %cst_8 : f32 to vector<16x1xf32>
    %23 = arith.mulf %22, %16 : vector<16x1xf32>
    %24 = arith.subf %21, %23 : vector<16x1xf32>
    %cst_9 = arith.constant 1.000000e-01 : f32
    %25 = vector.broadcast %cst_9 : f32 to vector<16x1xf32>
    %26 = arith.mulf %25, %20 : vector<16x1xf32>
    %27 = arith.subf %24, %26 : vector<16x1xf32>
    %c0_10 = arith.constant 0 : index
    %c0_11 = arith.constant 0 : index
    %28 = vector.load %arg3[%c0_10, %c0_11] : memref<16x1xf32, #tpu.memory_space<vmem>>, vector<16x1xf32>
    tpu.vector_store %arg3[%c0_10, %c0_11], %27 {strides = array<i32>} : memref<16x1xf32, #tpu.memory_space<vmem>>, vector<16x1xf32>,
    return
  }
  func.func @transform_0(%arg0: i32) -> (i32, i32) {
    %c0_i32 = arith.constant 0 : i32
    %c0_i32_0 = arith.constant 0 : i32
    return %arg0, %c0_i32 : i32, i32
  }
  func.func @transform_1(%arg0: i32) -> (i32, i32) {
    %c0_i32 = arith.constant 0 : i32
    %c0_i32_0 = arith.constant 0 : i32
    return %arg0, %c0_i32 : i32, i32
  }
  func.func @transform_2(%arg0: i32) -> (i32, i32) {
    %c0_i32 = arith.constant 0 : i32
    %c0_i32_0 = arith.constant 0 : i32
    return %arg0, %c0_i32 : i32, i32
  }
}

</mosaic_0001>

<bundles_post_ra>
// kernel: tpu_custom_call.1
= control target key start
LH: loop header
LB: loop body
LE: loop exit
PB: predicated region body
PF: predicated region fallthrough
CT: control target
= control target key end

     0   :  { %vm15_vm0 = vcmask 261120   ;;  %v92_v1 = vmov 0   ;;  %v38_v7 = vlaneseq  ;;  %vm74_vm3 = vcmask 7168   ;;  %s134_s0 = inlined_call_operand.vmem [shape: f32[16,32], index: 0, kind: input, shape index: {}]   ;;  %s135_s1 = inlined_call_operand.vmem [shape: s32[16,1], index: 1, kind: input, shape index: {}]   ;;  %s136_s2 = inlined_call_operand.vmem [shape: f32[16,1], index: 2, kind: output, shape index: {}]  }
   0x1   :  { %v11_v0 = vld [vmem:[%s134_s0] sm:$0xff]  ;;  %82 = vset.pattern.permute.xlu1 %v92_v1  ;;  %83 = vset.pattern.permute.xlu0 %v92_v1  ;;  %v12_v4 = vld [vmem:[%s134_s0 + $0x8] sm:$0xff] }
   0x2   :  { %v13_v2 = vld [vmem:[%s135_s1] sm:$0xff]  ;;  %v16_v3 = vsel %vm15_vm0, %v11_v0, -inf  ;;  %v14_v5 = vld [vmem:[%s135_s1 + $0x8] sm:$0xff]  ;;  %v19_v6 = vsel %vm15_vm0, %v12_v4, -inf  ;;  %v39_v8 = vand.u32 127, %v38_v7  ;;  %v59_v16 = vsel %vm15_vm0, %v12_v4, 0.0 }
   0x3   :  { %41 = vperm.xlu1 %82, %v13_v2   ;;  %17 = vmax.xlane.f32.xlu0 %v16_v3  ;;  %v56_v26 = vsel %vm15_vm0, %v11_v0, 0.0 }
   0xb   :  { %44 = vperm.xlu1 %82, %v14_v5   ;;  %20 = vmax.xlane.f32.xlu0 %v19_v6 }
  0x75   :  { %v42_v9 = vpop.permute.xlu1 %41 }
  0x76   :  { %vm46_vm1 = vcmp.eq.s32.totalorder %v39_v8, %v42_v9  ;;  %v18_v10 = vpop.xlane.xlu0 %17 }
  0x77   :  { %v48_v11 = vsel %vm46_vm1, %v11_v0, 0.0  ;;  %v22_v12 = vsub.f32 %v11_v0, %v18_v10 }
  0x78   :  { %v50_v13 = vsel %vm15_vm0, %v48_v11, 0.0 }
  0x79   :  { %51 = vadd.xlane.f32.xlu0 %v50_v13  ;;  %v24_v14 = vmul.f32 1.442695, %v22_v12 }
  0x7b   :  { %84 = vpow2.f32 %v24_v14 }
  0x7d   :  { %v45_v15 = vpop.permute.xlu1 %44 }
  0x7e   :  { %vm47_vm2 = vcmp.eq.s32.totalorder %v39_v8, %v45_v15  ;;  %v21_v17 = vpop.xlane.xlu0 %20 }
  0x7f   :  { %v49_v18 = vsel %vm47_vm2, %v12_v4, 0.0  ;;  %v23_v19 = vsub.f32 %v12_v4, %v21_v17 }
  0x80   :  { %v53_v20 = vsel %vm15_vm0, %v49_v18, 0.0 }
  0x81   :  { %54 = vadd.xlane.f32.xlu1 %v53_v20  ;;  %60 = vadd.xlane.f32.xlu0 %v59_v16  ;;  %v85_v21 = vpop.eup %84  ;;  %v26_v22 = vmul.f32 1.442695, %v23_v19 }
  0x82   :  { %v28_v23 = vsel %vm15_vm0, %v85_v21, 0.0 }
  0x83   :  { %86 = vpow2.f32 %v26_v22  ;;  %29 = vadd.xlane.f32.xlu2 %v28_v23 }
  0x89   :  { %v87_v24 = vpop.eup %86 }
  0x8a   :  { %v31_v25 = vsel %vm15_vm0, %v87_v24, 0.0 }
  0x8b   :  { %32 = vadd.xlane.f32.xlu2 %v31_v25 }
  0x93   :  { %57 = vadd.xlane.f32.xlu2 %v56_v26 }
  0xec   :  { %v52_v28 = vpop.xlane.xlu0 %51 }
  0xed   :  { %v66_v37 = vmul.f32 0.9, %v52_v28 }
  0xf4   :  { %v61_v32 = vpop.xlane.xlu0 %60  ;;  %v55_v36 = vpop.xlane.xlu1 %54 }
  0xf5   :  { %v63_v33 = vmul.f32 0.03125, %v61_v32  ;;  %v67_v42 = vmul.f32 0.9, %v55_v36 }
  0xf6   :  { %v30_v27 = vpop.xlane.xlu2 %29 }
  0xf7   :  { %88 = vlog2.f32 %v30_v27  ;;  %v71_v43 = vmul.f32 0.1, %v63_v33 }
  0xfd   :  { %v89_v29 = vpop.eup %88 }
  0xfe   :  { %v33_v30 = vpop.xlane.xlu2 %32  ;;  %v35_v31 = vmul.f32 0.6931472, %v89_v29 }
  0xff   :  { %90 = vlog2.f32 %v33_v30 }
 0x100   :  { %v64_v35 = vadd.f32 %v35_v31, %v18_v10 }
 0x102   :  { %v68_v44 = vsub.f32 %v64_v35, %v66_v37 }
 0x105   :  { %v91_v34 = vpop.eup %90 }
 0x106   :  { %v37_v38 = vmul.f32 0.6931472, %v91_v34  ;;  %v58_v39 = vpop.xlane.xlu2 %57 }
 0x107   :  { %v62_v40 = vmul.f32 0.03125, %v58_v39 }
 0x108   :  { %v65_v41 = vadd.f32 %v37_v38, %v21_v17 }
 0x109   :  { %v70_v45 = vmul.f32 0.1, %v62_v40 }
 0x10a   :  { %v69_v46 = vsub.f32 %v65_v41, %v67_v42 }
 0x10b   :  { %v72_v47 = vsub.f32 %v68_v44, %v70_v45 }
 0x10c   :  { %v73_v48 = vsub.f32 %v69_v46, %v71_v43 }
 0x10d   :  { %75 = vst.msk [vmem:[%s136_s2] sm:$0xff] %vm74_vm3, %v72_v47 }
 0x10e   :  { %76 = vst.msk [vmem:[%s136_s2 + $0x8] sm:$0xff] %vm74_vm3, %v73_v48 }

</bundles_post_ra>
